<compile_context>
chip_gen: v7x
topology: tpu7x:2x2x1
jax: 0.10.0
libtpu: 0.0.40
codegen_flags: <defaults>
</compile_context>

<pallas_src>
import functools

import jax
import jax.numpy as jnp
from jax.experimental import pallas as pl
from jax.experimental.pallas import tpu as pltpu


def _round_up(x, m):
    return ((x + m - 1) // m) * m


def mapping_kernel(x_ref, w_mu_ref, b_mu_ref, w_std_ref, b_std_ref,
                   w_dis_ref, b_dis_ref, w_cls_ref, b_cls_ref, noise_ref,
                   mus_ref, stds_ref, dis_ref, pred_ref, enc_out_ref,
                   *, train_g):
    x = x_ref[...]                                              # (TB, resSize)

    # encoder: two narrow matmuls (mu-half / std-half) -> no in-kernel column slice
    mus = jnp.dot(x, w_mu_ref[...], preferred_element_type=jnp.float32)
    mus = mus + b_mu_ref[...].astype(jnp.float32)
    mus = jnp.where(mus > 0, mus, 0.2 * mus)                    # LeakyReLU(0.2)

    stds_pre = jnp.dot(x, w_std_ref[...], preferred_element_type=jnp.float32)
    stds_pre = stds_pre + b_std_ref[...].astype(jnp.float32)
    stds_pre = jnp.where(stds_pre > 0, stds_pre, 0.2 * stds_pre)
    stds = jax.nn.sigmoid(stds_pre)                             # (TB, L), f32

    # reparameterization: randn * sigma + mu
    enc_out = noise_ref[...].astype(jnp.float32) * stds + mus   # (TB, L)

    # discriminator Linear(L, 1): VPU multiply + lane reduction instead of an
    # N=1 MXU matmul (MXU stays free for the classifier matmul).
    dis_in = mus if train_g else enc_out
    w_dis_row = w_dis_ref[...].astype(jnp.float32)              # (1, L)
    dis_out = jnp.sum(dis_in * w_dis_row, axis=-1, keepdims=True) + b_dis_ref[0]

    # classifier + log-softmax over classes (dim=1), f32 reductions
    logits = jnp.dot(mus.astype(w_cls_ref.dtype), w_cls_ref[...],
                     preferred_element_type=jnp.float32)
    logits = logits + b_cls_ref[...].astype(jnp.float32)        # (TB, C)
    m = jnp.max(logits, axis=1, keepdims=True)
    lse = jnp.log(jnp.sum(jnp.exp(logits - m), axis=1, keepdims=True)) + m
    pred = logits - lse

    mus_ref[...] = mus.astype(mus_ref.dtype)
    stds_ref[...] = stds.astype(stds_ref.dtype)
    dis_ref[...] = dis_out.astype(dis_ref.dtype)
    pred_ref[...] = pred.astype(pred_ref.dtype)
    enc_out_ref[...] = enc_out.astype(enc_out_ref.dtype)


def mapping_forward(x, params, noise, *, laten_size, train_g=False,
                    tile_b=256, compute_dtype=None):
    """Mapping forward pass as a batch-tiled Pallas kernel.

    x:       (B, resSize)
    noise:   (B, latenSize)   -- stands in for torch.randn_like(mu)
    params:  dict of weights stored (in_features, out_features)
    compute_dtype: optionally cast x/noise/weights (e.g. jnp.bfloat16) for the
                   MXU; accumulation and outputs stay float32.
    """
    b, res = x.shape
    L = laten_size
    C = params["w_cls"].shape[1]

    # Split encoder weight/bias in the wrapper -> no in-kernel column slicing.
    w_enc = params["w_enc"]
    b_enc = params["b_enc"].reshape(1, 2 * L)
    w_mu, w_std = w_enc[:, :L], w_enc[:, L:]
    b_mu, b_std = b_enc[:, :L], b_enc[:, L:]
    w_dis = params["w_dis"].reshape(1, L)                     # row for VPU reduce
    b_dis = params["b_dis"].reshape(1,).astype(jnp.float32)   # scalar -> SMEM
    w_cls = params["w_cls"]
    b_cls = params["b_cls"].reshape(1, C)

    if compute_dtype is not None:
        cast = lambda a: a.astype(compute_dtype)
        x, noise = cast(x), cast(noise)
        w_mu, w_std, w_dis, w_cls = map(cast, (w_mu, w_std, w_dis, w_cls))

    # Batch tiling: pad B up to a multiple of the tile so block shapes stay legal.
    tb = min(tile_b, _round_up(b, 8))
    b_pad = _round_up(b, tb)
    if b_pad != b:
        x = jnp.pad(x, ((0, b_pad - b), (0, 0)))
        noise = jnp.pad(noise, ((0, b_pad - b), (0, 0)))
    grid = (b_pad // tb,)

    def row_spec(feat):                     # batch-tiled arrays
        return pl.BlockSpec((tb, feat), lambda i: (i, 0))

    def resident(shape):                    # weights/biases: VMEM-resident
        return pl.BlockSpec(shape, lambda i: (0, 0))

    in_specs = [
        row_spec(res),                                   # x
        resident((res, L)), resident((1, L)),            # w_mu, b_mu
        resident((res, L)), resident((1, L)),            # w_std, b_std
        resident((1, L)),                                # w_dis (row)
        pl.BlockSpec((1,), lambda i: (0,),
                     memory_space=pltpu.MemorySpace.SMEM),  # b_dis scalar
        resident((L, C)), resident((1, C)),              # w_cls, b_cls
        row_spec(L),                                     # noise
    ]
    out_specs = [
        row_spec(L),                                     # mus
        row_spec(L),                                     # stds
        pl.BlockSpec((tb, 1), lambda i: (i, 0)),         # dis_out
        row_spec(C),                                     # pred (log-softmax)
        row_spec(L),                                     # encoder_out
    ]
    out_shape = (
        jax.ShapeDtypeStruct((b_pad, L), jnp.float32),   # mus
        jax.ShapeDtypeStruct((b_pad, L), jnp.float32),   # stds
        jax.ShapeDtypeStruct((b_pad, 1), jnp.float32),   # dis_out
        jax.ShapeDtypeStruct((b_pad, C), jnp.float32),   # pred
        jax.ShapeDtypeStruct((b_pad, L), jnp.float32),   # encoder_out
    )

    flops = 2 * b_pad * (res * 2 * L + L * C + L)
    transcendentals = b_pad * (L + C)
    weight_bytes = sum(int(w.size) * w.dtype.itemsize
                       for w in (w_mu, w_std, w_dis, w_cls, b_mu, b_std, b_cls, b_dis))
    io_bytes = (int(x.size) * x.dtype.itemsize + int(noise.size) * noise.dtype.itemsize
                + 4 * b_pad * (3 * L + C + 1))
    cost = pl.CostEstimate(flops=flops, transcendentals=transcendentals,
                           bytes_accessed=weight_bytes + io_bytes)

    outs = pl.pallas_call(
        functools.partial(mapping_kernel, train_g=train_g),
        out_shape=out_shape,
        grid=grid,
        in_specs=in_specs,
        out_specs=out_specs,
        compiler_params=pltpu.CompilerParams(
            dimension_semantics=("parallel",),      # shard batch tiles across TCs
            vmem_limit_bytes=32 * 1024 * 1024),     # raise v5e's 16 MiB default
        cost_estimate=cost,
    )(x, w_mu, b_mu, w_std, b_std, w_dis, b_dis, w_cls, b_cls, noise)

    if b_pad != b:
        outs = tuple(o[:b] for o in outs)
    return outs


def init_params(key, res_size, laten_size, nclass_seen):
    """weights_init: Linear weights ~ N(0, 0.02), bias = 0; stored (in, out)."""
    k1, k2, k3 = jax.random.split(key, 3)
    return {
        "w_enc": 0.02 * jax.random.normal(k1, (res_size, 2 * laten_size), jnp.float32),
        "b_enc": jnp.zeros((1, 2 * laten_size), jnp.float32),
        "w_dis": 0.02 * jax.random.normal(k2, (laten_size, 1), jnp.float32),
        "b_dis": jnp.zeros((1, 1), jnp.float32),
        "w_cls": 0.02 * jax.random.normal(k3, (laten_size, nclass_seen), jnp.float32),
        "b_cls": jnp.zeros((1, nclass_seen), jnp.float32),
    }


def reference_forward(x, params, noise, *, laten_size, train_g=False):
    """Pure-JAX reference for the correctness check."""
    laten = x @ params["w_enc"] + params["b_enc"]
    laten = jnp.where(laten > 0, laten, 0.2 * laten)
    mus = laten[:, :laten_size]
    stds = jax.nn.sigmoid(laten[:, laten_size:])
    enc_out = noise * stds + mus
    dis_in = mus if train_g else enc_out
    dis_out = dis_in @ params["w_dis"] + params["b_dis"]
    logits = mus @ params["w_cls"] + params["b_cls"]
    pred = jax.nn.log_softmax(logits, axis=1)
    return mus, stds, dis_out, pred, enc_out


if __name__ == "__main__":
    # Small synthetic config (opt.resSize, opt.latenSize, opt.nclass_seen)
    B, RES_SIZE, LATEN_SIZE, NCLASS_SEEN = 8, 32, 16, 8

    key = jax.random.PRNGKey(0)
    kx, kn, kp = jax.random.split(key, 3)

    x = jax.random.normal(kx, (B, RES_SIZE), jnp.float32)
    noise = jax.random.normal(kn, (B, LATEN_SIZE), jnp.float32)  # torch.randn_like(mu)
    params = init_params(kp, RES_SIZE, LATEN_SIZE, NCLASS_SEEN)

    for train_g in (False, True):
        outs = mapping_forward(x, params, noise,
                               laten_size=LATEN_SIZE, train_g=train_g)
        outs = jax.block_until_ready(outs)
        refs = reference_forward(x, params, noise,
                                 laten_size=LATEN_SIZE, train_g=train_g)
        for o, r in zip(outs, refs):
            assert o.shape == r.shape and o.dtype == r.dtype
            assert jnp.allclose(o, r, atol=1e-5, rtol=1e-5), "mismatch vs reference"

    print("KERNEL_OK")
</pallas_src>

<mosaic_0001>
module attributes {stable_mosaic.version = 11 : i64} {
  func.func @mapping_kernel(%arg0: i32, %arg1: memref<8x32xf32, #tpu.memory_space<vmem>>, %arg2: memref<32x16xf32, #tpu.memory_space<vmem>>, %arg3: memref<1x16xf32, #tpu.memory_space<vmem>>, %arg4: memref<32x16xf32, #tpu.memory_space<vmem>>, %arg5: memref<1x16xf32, #tpu.memory_space<vmem>>, %arg6: memref<1x16xf32, #tpu.memory_space<vmem>>, %arg7: memref<1xf32, #tpu.memory_space<smem>>, %arg8: memref<16x8xf32, #tpu.memory_space<vmem>>, %arg9: memref<1x8xf32, #tpu.memory_space<vmem>>, %arg10: memref<8x16xf32, #tpu.memory_space<vmem>>, %arg11: memref<8x16xf32, #tpu.memory_space<vmem>>, %arg12: memref<8x16xf32, #tpu.memory_space<vmem>>, %arg13: memref<8x1xf32, #tpu.memory_space<vmem>>, %arg14: memref<8x8xf32, #tpu.memory_space<vmem>>, %arg15: memref<8x16xf32, #tpu.memory_space<vmem>>) attributes {dimension_semantics = [#tpu.dimension_semantics<parallel>], iteration_bounds = array<i64: 1>, scalar_prefetch = 0 : i64, scratch_operands = 0 : i64, tpu.core_type = #tpu.core_type<tc>, window_params = [{transform_indices = @transform_0, window_bounds = array<i64: 8, 32>}, {pipeline_mode = #tpu.pipeline_mode<synchronous>, transform_indices = @transform_1, window_bounds = array<i64: 32, 16>}, {pipeline_mode = #tpu.pipeline_mode<synchronous>, transform_indices = @transform_2, window_bounds = array<i64: 1, 16>}, {pipeline_mode = #tpu.pipeline_mode<synchronous>, transform_indices = @transform_3, window_bounds = array<i64: 32, 16>}, {pipeline_mode = #tpu.pipeline_mode<synchronous>, transform_indices = @transform_4, window_bounds = array<i64: 1, 16>}, {pipeline_mode = #tpu.pipeline_mode<synchronous>, transform_indices = @transform_5, window_bounds = array<i64: 1, 16>}, {transform_indices = @transform_6, window_bounds = array<i64: 1>}, {pipeline_mode = #tpu.pipeline_mode<synchronous>, transform_indices = @transform_7, window_bounds = array<i64: 16, 8>}, {pipeline_mode = #tpu.pipeline_mode<synchronous>, transform_indices = @transform_8, window_bounds = array<i64: 1, 8>}, {transform_indices = @transform_9, window_bounds = array<i64: 8, 16>}, {transform_indices = @transform_10, window_bounds = array<i64: 8, 16>}, {transform_indices = @transform_11, window_bounds = array<i64: 8, 16>}, {transform_indices = @transform_12, window_bounds = array<i64: 8, 1>}, {transform_indices = @transform_13, window_bounds = array<i64: 8, 8>}, {transform_indices = @transform_14, window_bounds = array<i64: 8, 16>}]} {
    %c0 = arith.constant 0 : index
    %c0_0 = arith.constant 0 : index
    %0 = vector.load %arg1[%c0, %c0_0] : memref<8x32xf32, #tpu.memory_space<vmem>>, vector<8x32xf32>
    %c0_1 = arith.constant 0 : index
    %c0_2 = arith.constant 0 : index
    %1 = vector.load %arg2[%c0_1, %c0_2] : memref<32x16xf32, #tpu.memory_space<vmem>>, vector<32x16xf32>
    %cst = arith.constant dense<0.000000e+00> : vector<8x16xf32>
    %2 = tpu.matmul %0, %1, %cst {dimension_numbers = #tpu.dot_dimension_numbers<[1], [0], [0], [1], [0, 0, 1, 1], [], []>} : vector<8x32xf32>, vector<32x16xf32>, vector<8x16xf32> -> vector<8x16xf32>
    %c0_3 = arith.constant 0 : index
    %c0_4 = arith.constant 0 : index
    %3 = vector.load %arg3[%c0_3, %c0_4] : memref<1x16xf32, #tpu.memory_space<vmem>>, vector<1x16xf32>
    %4 = vector.broadcast %3 : vector<1x16xf32> to vector<8x16xf32>
    %5 = arith.addf %2, %4 : vector<8x16xf32>
    %cst_5 = arith.constant 0.000000e+00 : f32
    %6 = vector.broadcast %cst_5 : f32 to vector<8x16xf32>
    %7 = arith.cmpf ogt, %5, %6 : vector<8x16xf32>
    %cst_6 = arith.constant 2.000000e-01 : f32
    %8 = vector.broadcast %cst_6 : f32 to vector<8x16xf32>
    %9 = arith.mulf %8, %5 : vector<8x16xf32>
    %10 = arith.select %7, %5, %9 : vector<8x16xi1>, vector<8x16xf32>
    %c0_7 = arith.constant 0 : index
    %c0_8 = arith.constant 0 : index
    %11 = vector.load %arg4[%c0_7, %c0_8] : memref<32x16xf32, #tpu.memory_space<vmem>>, vector<32x16xf32>
    %cst_9 = arith.constant dense<0.000000e+00> : vector<8x16xf32>
    %12 = tpu.matmul %0, %11, %cst_9 {dimension_numbers = #tpu.dot_dimension_numbers<[1], [0], [0], [1], [0, 0, 1, 1], [], []>} : vector<8x32xf32>, vector<32x16xf32>, vector<8x16xf32> -> vector<8x16xf32>
    %c0_10 = arith.constant 0 : index
    %c0_11 = arith.constant 0 : index
    %13 = vector.load %arg5[%c0_10, %c0_11] : memref<1x16xf32, #tpu.memory_space<vmem>>, vector<1x16xf32>
    %14 = vector.broadcast %13 : vector<1x16xf32> to vector<8x16xf32>
    %15 = arith.addf %12, %14 : vector<8x16xf32>
    %cst_12 = arith.constant 0.000000e+00 : f32
    %16 = vector.broadcast %cst_12 : f32 to vector<8x16xf32>
    %17 = arith.cmpf ogt, %15, %16 : vector<8x16xf32>
    %cst_13 = arith.constant 2.000000e-01 : f32
    %18 = vector.broadcast %cst_13 : f32 to vector<8x16xf32>
    %19 = arith.mulf %18, %15 : vector<8x16xf32>
    %20 = arith.select %17, %15, %19 : vector<8x16xi1>, vector<8x16xf32>
    %21 = arith.negf %20 : vector<8x16xf32>
    %22 = math.exp %21 : vector<8x16xf32>
    %cst_14 = arith.constant 1.000000e+00 : f32
    %23 = vector.broadcast %cst_14 : f32 to vector<8x16xf32>
    %24 = arith.addf %23, %22 : vector<8x16xf32>
    %25 = arith.divf %23, %24 : vector<8x16xf32>
    %c0_15 = arith.constant 0 : index
    %c0_16 = arith.constant 0 : index
    %26 = vector.load %arg10[%c0_15, %c0_16] : memref<8x16xf32, #tpu.memory_space<vmem>>, vector<8x16xf32>
    %27 = arith.mulf %26, %25 : vector<8x16xf32>
    %28 = arith.addf %27, %10 : vector<8x16xf32>
    %c0_17 = arith.constant 0 : index
    %c0_18 = arith.constant 0 : index
    %29 = vector.load %arg6[%c0_17, %c0_18] : memref<1x16xf32, #tpu.memory_space<vmem>>, vector<1x16xf32>
    %30 = vector.broadcast %29 : vector<1x16xf32> to vector<8x16xf32>
    %31 = arith.mulf %28, %30 : vector<8x16xf32>
    %cst_19 = arith.constant dense<0.000000e+00> : vector<8xf32>
    %32 = vector.multi_reduction <add>, %31, %cst_19 [1] : vector<8x16xf32> to vector<8xf32>
    %33 = vector.shape_cast %32 : vector<8xf32> to vector<8x1xf32>
    %c0_20 = arith.constant 0 : index
    %34 = memref.load %arg7[%c0_20] : memref<1xf32, #tpu.memory_space<smem>>
    %35 = vector.broadcast %34 : f32 to vector<8x1xf32>
    %36 = arith.addf %33, %35 : vector<8x1xf32>
    %c0_21 = arith.constant 0 : index
    %c0_22 = arith.constant 0 : index
    %37 = vector.load %arg8[%c0_21, %c0_22] : memref<16x8xf32, #tpu.memory_space<vmem>>, vector<16x8xf32>
    %cst_23 = arith.constant dense<0.000000e+00> : vector<8x8xf32>
    %38 = tpu.matmul %10, %37, %cst_23 {dimension_numbers = #tpu.dot_dimension_numbers<[1], [0], [0], [1], [0, 0, 1, 1], [], []>} : vector<8x16xf32>, vector<16x8xf32>, vector<8x8xf32> -> vector<8x8xf32>
    %c0_24 = arith.constant 0 : index
    %c0_25 = arith.constant 0 : index
    %39 = vector.load %arg9[%c0_24, %c0_25] : memref<1x8xf32, #tpu.memory_space<vmem>>, vector<1x8xf32>
    %40 = vector.broadcast %39 : vector<1x8xf32> to vector<8x8xf32>
    %41 = arith.addf %38, %40 : vector<8x8xf32>
    %cst_26 = arith.constant dense<0xFF800000> : vector<8xf32>
    %42 = vector.multi_reduction <maximumf>, %41, %cst_26 [1] : vector<8x8xf32> to vector<8xf32>
    %43 = vector.shape_cast %42 : vector<8xf32> to vector<8x1xf32>
    %44 = vector.broadcast %43 : vector<8x1xf32> to vector<8x8xf32>
    %45 = arith.subf %41, %44 : vector<8x8xf32>
    %46 = math.exp %45 : vector<8x8xf32>
    %cst_27 = arith.constant dense<0.000000e+00> : vector<8xf32>
    %47 = vector.multi_reduction <add>, %46, %cst_27 [1] : vector<8x8xf32> to vector<8xf32>
    %48 = vector.shape_cast %47 : vector<8xf32> to vector<8x1xf32>
    %49 = math.log %48 : vector<8x1xf32>
    %50 = arith.addf %49, %43 : vector<8x1xf32>
    %51 = vector.broadcast %50 : vector<8x1xf32> to vector<8x8xf32>
    %52 = arith.subf %41, %51 : vector<8x8xf32>
    %c0_28 = arith.constant 0 : index
    %c0_29 = arith.constant 0 : index
    %53 = vector.load %arg11[%c0_28, %c0_29] : memref<8x16xf32, #tpu.memory_space<vmem>>, vector<8x16xf32>
    tpu.vector_store %arg11[%c0_28, %c0_29], %10 {strides = array<i32>} : memref<8x16xf32, #tpu.memory_space<vmem>>, vector<8x16xf32>,
    %c0_30 = arith.constant 0 : index
    %c0_31 = arith.constant 0 : index
    %54 = vector.load %arg12[%c0_30, %c0_31] : memref<8x16xf32, #tpu.memory_space<vmem>>, vector<8x16xf32>
    tpu.vector_store %arg12[%c0_30, %c0_31], %25 {strides = array<i32>} : memref<8x16xf32, #tpu.memory_space<vmem>>, vector<8x16xf32>,
    %c0_32 = arith.constant 0 : index
    %c0_33 = arith.constant 0 : index
    %55 = vector.load %arg13[%c0_32, %c0_33] : memref<8x1xf32, #tpu.memory_space<vmem>>, vector<8x1xf32>
    tpu.vector_store %arg13[%c0_32, %c0_33], %36 {strides = array<i32>} : memref<8x1xf32, #tpu.memory_space<vmem>>, vector<8x1xf32>,
    %c0_34 = arith.constant 0 : index
    %c0_35 = arith.constant 0 : index
    %56 = vector.load %arg14[%c0_34, %c0_35] : memref<8x8xf32, #tpu.memory_space<vmem>>, vector<8x8xf32>
    tpu.vector_store %arg14[%c0_34, %c0_35], %52 {strides = array<i32>} : memref<8x8xf32, #tpu.memory_space<vmem>>, vector<8x8xf32>,
    %c0_36 = arith.constant 0 : index
    %c0_37 = arith.constant 0 : index
    %57 = vector.load %arg15[%c0_36, %c0_37] : memref<8x16xf32, #tpu.memory_space<vmem>>, vector<8x16xf32>
    tpu.vector_store %arg15[%c0_36, %c0_37], %28 {strides = array<i32>} : memref<8x16xf32, #tpu.memory_space<vmem>>, vector<8x16xf32>,
    return
  }
  func.func @transform_0(%arg0: i32) -> (i32, i32) {
    %c0_i32 = arith.constant 0 : i32
    %c0_i32_0 = arith.constant 0 : i32
    return %arg0, %c0_i32 : i32, i32
  }
  func.func @transform_1(%arg0: i32) -> (i32, i32) {
    %c0_i32 = arith.constant 0 : i32
    %c0_i32_0 = arith.constant 0 : i32
    %c0_i32_1 = arith.constant 0 : i32
    return %c0_i32, %c0_i32_0 : i32, i32
  }
  func.func @transform_2(%arg0: i32) -> (i32, i32) {
    %c0_i32 = arith.constant 0 : i32
    %c0_i32_0 = arith.constant 0 : i32
    %c0_i32_1 = arith.constant 0 : i32
    return %c0_i32, %c0_i32_0 : i32, i32
  }
  func.func @transform_3(%arg0: i32) -> (i32, i32) {
    %c0_i32 = arith.constant 0 : i32
    %c0_i32_0 = arith.constant 0 : i32
    %c0_i32_1 = arith.constant 0 : i32
    return %c0_i32, %c0_i32_0 : i32, i32
  }
  func.func @transform_4(%arg0: i32) -> (i32, i32) {
    %c0_i32 = arith.constant 0 : i32
    %c0_i32_0 = arith.constant 0 : i32
    %c0_i32_1 = arith.constant 0 : i32
    return %c0_i32, %c0_i32_0 : i32, i32
  }
  func.func @transform_5(%arg0: i32) -> (i32, i32) {
    %c0_i32 = arith.constant 0 : i32
    %c0_i32_0 = arith.constant 0 : i32
    %c0_i32_1 = arith.constant 0 : i32
    return %c0_i32, %c0_i32_0 : i32, i32
  }
  func.func @transform_6(%arg0: i32) -> i32 {
    %c0_i32 = arith.constant 0 : i32
    %c0_i32_0 = arith.constant 0 : i32
    return %c0_i32 : i32
  }
  func.func @transform_7(%arg0: i32) -> (i32, i32) {
    %c0_i32 = arith.constant 0 : i32
    %c0_i32_0 = arith.constant 0 : i32
    %c0_i32_1 = arith.constant 0 : i32
    return %c0_i32, %c0_i32_0 : i32, i32
  }
  func.func @transform_8(%arg0: i32) -> (i32, i32) {
    %c0_i32 = arith.constant 0 : i32
    %c0_i32_0 = arith.constant 0 : i32
    %c0_i32_1 = arith.constant 0 : i32
    return %c0_i32, %c0_i32_0 : i32, i32
  }
  func.func @transform_9(%arg0: i32) -> (i32, i32) {
    %c0_i32 = arith.constant 0 : i32
    %c0_i32_0 = arith.constant 0 : i32
    return %arg0, %c0_i32 : i32, i32
  }
  func.func @transform_10(%arg0: i32) -> (i32, i32) {
    %c0_i32 = arith.constant 0 : i32
    %c0_i32_0 = arith.constant 0 : i32
    return %arg0, %c0_i32 : i32, i32
  }
  func.func @transform_11(%arg0: i32) -> (i32, i32) {
    %c0_i32 = arith.constant 0 : i32
    %c0_i32_0 = arith.constant 0 : i32
    return %arg0, %c0_i32 : i32, i32
  }
  func.func @transform_12(%arg0: i32) -> (i32, i32) {
    %c0_i32 = arith.constant 0 : i32
    %c0_i32_0 = arith.constant 0 : i32
    return %arg0, %c0_i32 : i32, i32
  }
  func.func @transform_13(%arg0: i32) -> (i32, i32) {
    %c0_i32 = arith.constant 0 : i32
    %c0_i32_0 = arith.constant 0 : i32
    return %arg0, %c0_i32 : i32, i32
  }
  func.func @transform_14(%arg0: i32) -> (i32, i32) {
    %c0_i32 = arith.constant 0 : i32
    %c0_i32_0 = arith.constant 0 : i32
    return %arg0, %c0_i32 : i32, i32
  }
}

</mosaic_0001>

<bundles_post_ra>
// kernel: tpu_custom_call.1
= control target key start
LH: loop header
LB: loop body
LE: loop exit
PB: predicated region body
PF: predicated region fallthrough
CT: control target
= control target key end

     0   :  { %21 = vsyncpa [#allocation4], 0  ;;  %s776_s0 = inlined_call_operand.vmem [shape: f32[8,32], index: 0, kind: input, shape index: {}]   ;;  %s777_s1 = inlined_call_operand.vmem [shape: f32[32,16], index: 1, kind: input, shape index: {}]   ;;  %s778_s2 = inlined_call_operand.vmem [shape: f32[1,16], index: 2, kind: input, shape index: {}]   ;;  %s779_s3 = inlined_call_operand.vmem [shape: f32[32,16], index: 3, kind: input, shape index: {}]   ;;  %s780_s4 = inlined_call_operand.vmem [shape: f32[1,16], index: 4, kind: input, shape index: {}]   ;;  %s781_s5 = inlined_call_operand.vmem [shape: f32[1,16], index: 5, kind: input, shape index: {}]   ;;  %s782_s6 = inlined_call_operand.<no memory space> [shape: f32[1], index: 6, kind: input, shape index: {}]   ;;  %s783_s7 = inlined_call_operand.vmem [shape: f32[16,8], index: 7, kind: input, shape index: {}]   ;;  %s784_s8 = inlined_call_operand.vmem [shape: f32[1,8], index: 8, kind: input, shape index: {}]   ;;  %s785_s9 = inlined_call_operand.vmem [shape: f32[8,16], index: 9, kind: input, shape index: {}]   ;;  %s786_s10 = inlined_call_operand.hbm [shape: f32[8,16], index: 10, kind: output, shape index: {0}]   ;;  %s787_s11 = inlined_call_operand.hbm [shape: f32[8,16], index: 11, kind: output, shape index: {1}]   ;;  %s788_s12 = inlined_call_operand.vmem [shape: f32[8,1], index: 12, kind: output, shape index: {2}]   ;;  %s789_s13 = inlined_call_operand.hbm [shape: f32[8,8], index: 13, kind: output, shape index: {3}]   ;;  %s790_s14 = inlined_call_operand.hbm [shape: f32[8,16], index: 14, kind: output, shape index: {4}]  }
   0x1   :  { %22 = vsyncpa [#allocation6], 0  ;;  %v45_v0 = vld [vmem:[%s777_s1] sm:$0xff]  ;;  %v46_v1 = vld [vmem:[%s777_s1 + $0x8] sm:$0xff]  ;;  %v576_v3 = vmov 0.0|0.0   ;;  %vm577_vm0 = vmmov 0  }
   0x2   :  { %v133_v2 = vld [vmem:[%s779_s3] sm:$0xff]  ;;  %452 = vmatprep.subr.bf16.mxu0 %v576_v3  ;;  %458 = vmatprep.subr.bf16.mxu1 %v576_v3  ;;  %v453_v4 = vpack.c.bf16 %v46_v1, %v45_v0  ;;  %v134_v5 = vld [vmem:[%s779_s3 + $0x8] sm:$0xff]  ;;  %v47_v6 = vld [vmem:[%s777_s1 + $0x10] sm:$0xff]  ;;  %v578_v11 = vmov 0.0  }
   0x3   :  { %v48_v7 = vld [vmem:[%s777_s1 + $0x18] sm:$0xff]  ;;  %v459_v8 = vpack.c.bf16 %v134_v5, %v133_v2  ;;  %v135_v9 = vld [vmem:[%s779_s3 + $0x10] sm:$0xff]  ;;  %431 = vmatprep.mubr.msk.f32.mxu0 %vm577_vm0, %v578_v11  ;;  %442 = vmatprep.mubr.msk.f32.mxu1 %vm577_vm0, %v578_v11 }
   0x4   :  { %v136_v10 = vld [vmem:[%s779_s3 + $0x18] sm:$0xff]  ;;  %454 = vmatpush3.bf16.msra.mxu0 %v453_v4  ;;  %v456_v12 = vpack.c.bf16 %v48_v7, %v47_v6 }
   0x5   :  { %23 = vsyncpa [#allocation9], 0  ;;  %460 = vmatpush3.bf16.msra.mxu1 %v459_v8  ;;  %455 = vmatprep.subr.bf16.mxu0 %v576_v3  ;;  %v462_v13 = vpack.c.bf16 %v136_v10, %v135_v9  ;;  %v44_v14 = vld [vmem:[%s776_s0] sm:$0xff]  ;;  %vm56_vm1 = vcmask 261120   ;;  %v242_v16 = vld [vmem:[%s783_s7 + $0x8] sm:$0xff]  ;;  %vm234_vm3 = vcmask 130048   ;;  %v239_v40 = vstv %s782_s6 }
   0x6   :  { %461 = vmatprep.subr.bf16.mxu1 %v576_v3  ;;  %v241_v15 = vld [vmem:[%s783_s7] sm:$0xff]  ;;  %vm339_vm5 = vcmask 7168   ;;  %vm323_vm6 = vcmask 64512   ;;  %s579_s6 = smov [#allocation5]  }
   0x7   :  { %v465_v17 = vpack.c.bf16 %v242_v16, %v241_v15  ;;  %v402_v18 = vld [vmem:[%s778_s2] ss:$0 sm:$0xff] }
   0x8   :  { %457 = vmatpush3.bf16.msra.mxu0 %v456_v12  ;;  %v404_v19 = vld [vmem:[%s780_s4] ss:$0 sm:$0xff] }
   0x9   :  { %463 = vmatpush3.bf16.msra.mxu1 %v462_v13  ;;  %464 = vmatprep.subr.bf16.mxu0 %v576_v3  ;;  %v223_v33 = vld [vmem:[%s785_s9] sm:$0xff] }
   0xa   :  { %v407_v36 = vld [vmem:[%s781_s5] ss:$0 sm:$0xff] }
   0xb   :  { %432 = vmatmul.mubr.msk.f32.vlgmr.msra.gmra.mrb[0].mxu0 %vm56_vm1, %v44_v14  ;;  %v408_v43 = vld [vmem:[%s784_s8] ss:$0 sm:$0xff]  ;;  %s359_s8 = sshll.u32 %s579_s6, 4  ;;  %s360_s8 = int_to_ptr.vmem [resolvable:$true] %s359_s8 }
   0xc   :  { %443 = vmatmul.mubr.msk.f32.vlgmr.msra.gmra.mrb[0].mxu1 %vm56_vm1, %v44_v14  ;;  %449 = vmatprep.mubr.msk.f32.mxu0 %vm577_vm0, %v578_v11  ;;  %s482_s26 = scalar_lea.vmem %s360_s8, 128  ;;  %p487_p1 = scmp.lt.s32.totalorder %s360_s8, %s360_s8 }
   0xd   :  { %466 = vmatpush3.bf16.msra.mxu0 %v465_v17  ;;  %p483_p0 = scmp.ne.s32.totalorder %s360_s8, %s482_s26  ;;  %p488_p2 = scmp.lt.s32.totalorder %s482_s26, %s482_s26 }
   0xf   :  { %p489_p3 = por %p488_p2, %p487_p1 }
  0x11   :  { %p490_p4 = pnand %p489_p3, %p483_p0 }
  0xde   :  { %v126_v20 = vpop.f32.mrb[0].mxu0 }
  0xdf   :  { %v127_v21 = vadd.f32 %v402_v18, %v126_v20  ;;  %v210_v22 = vpop.f32.mrb[0].mxu1  ;;  %v433_v23 = vpop.f32.mrb[1].mxu0 }
  0xe0   :  { %v211_v24 = vadd.f32 %v404_v19, %v210_v22  ;;  %v444_v25 = vpop.f32.mrb[1].mxu1 }
  0xe1   :  { %vm130_vm2 = vcmp.gt.f32.partialorder %v127_v21, 0.0  ;;  %v131_v26 = vmul.f32 0.2, %v127_v21 }
  0xe2   :  { %vm214_vm4 = vcmp.gt.f32.partialorder %v211_v24, 0.0  ;;  %v215_v27 = vmul.f32 0.2, %v211_v24 }
  0xe3   :  { %v132_v28 = vsel %vm130_vm2, %v127_v21, %v131_v26 }
  0xe4   :  { %v216_v29 = vsel %vm214_vm4, %v211_v24, %v215_v27  ;;  %450 = vmatmul.mubr.msk.f32.vlgmr.msra.gmra.mrb[2].mxu0 %vm234_vm3, %v132_v28  ;;  %337 = vst.msk [vmem:[#allocation3] sm:$0xff] %vm234_vm3, %v132_v28 }
  0xe5   :  { %v406_v30 = vmul.f32 -1.442695, %v216_v29 }
  0xe7   :  { %474 = vpow2.f32 %v406_v30 }
  0xf1   :  { %v475_v31 = vpop.eup %474 }
  0xf2   :  { %v220_v32 = vadd.f32 1.0, %v475_v31 }
  0xf4   :  { %476 = vrcp.f32 %v220_v32 }
  0xfe   :  { %v477_v34 = vpop.eup %476 }
  0xff   :  { %338 = vst.msk [vmem:[#allocation5] sm:$0xff] %vm234_vm3, %v477_v34  ;;  %v224_v35 = vmul.f32 %v477_v34, %v223_v33 }
 0x101   :  { %v225_v37 = vadd.f32 %v224_v35, %v132_v28 }
 0x103   :  { %v233_v38 = vmul.f32 %v407_v36, %v225_v37  ;;  %342 = vst.msk [vmem:[#allocation8] sm:$0xff] %vm234_vm3, %v225_v37 }
 0x105   :  { %v235_v39 = vsel %vm234_vm3, %v233_v38, 0.0 }
 0x106   :  { %236 = vadd.xlane.f32.xlu1 %v235_v39 }
 0x193   :  { %v237_v41 = vpop.xlane.xlu1 %236 }
 0x194   :  { %v240_v42 = vadd.f32 %v239_v40, %v237_v41 }
 0x196   :  { %340 = vst.msk [vmem:[%s788_s12] sm:$0xff] %vm339_vm5, %v240_v42  ;;  %s580_s12 = smov [#allocation3]  }
 0x197   :  { %s349_s25 = sshll.u32 %s580_s12, 4  ;;  %s350_s25 = int_to_ptr.vmem [resolvable:$true] %s349_s25 }
 0x1b7   :  { %v319_v44 = vpop.f32.mrb[2].mxu0 }
 0x1b8   :  { %v720_v45 = vadd.f32 %v408_v43, %v319_v44  ;;  %v451_v46 = vpop.f32.mrb[3].mxu0 }
 0x1ba   :  { %v324_v47 = vsel %vm323_vm6, %v720_v45, -inf }
 0x1bb   :  { %325 = vmax.xlane.f32.xlu0 %v324_v47 }
 0x248   :  { %v326_v48 = vpop.xlane.xlu0 %325 }
 0x249   :  { %v327_v49 = vsub.f32 %v720_v45, %v326_v48 }
 0x24b   :  { %v328_v50 = vmul.f32 1.442695, %v327_v49 }
 0x24d   :  { %478 = vpow2.f32 %v328_v50 }
 0x257   :  { %v479_v51 = vpop.eup %478 }
 0x258   :  { %v330_v52 = vsel %vm323_vm6, %v479_v51, 0.0 }
 0x259   :  { %331 = vadd.xlane.f32.xlu0 %v330_v52 }
 0x25a   :  { %493 = shalt.err (!%p490_p4)
}
 0x25b   :  { %s494_s1 = scalar_lea.hbm %s787_s11, 128 }
 0x25c   :  { %p495_p5 = scmp.ne.s32.totalorder %s787_s11, %s494_s1  ;;  %p498_p6 = scmp.lt.u32.totalorder %s494_s1, %s787_s11 }
 0x25e   :  { %p500_p7 = pnand %p498_p6, %p495_p5 }
 0x260   :  { %503 = shalt.err (!%p500_p7)
}
 0x261   :  { %362 = dma.vmem_to_hbm [thread:$0]  %s360_s8, 128, %s787_s11, [#allocation6]  }
 0x262   :  { %s504_s18 = scalar_lea.vmem %s350_s25, 128  ;;  %p509_p9 = scmp.lt.s32.totalorder %s350_s25, %s350_s25 }
 0x263   :  { %p505_p8 = scmp.ne.s32.totalorder %s350_s25, %s504_s18  ;;  %p510_p10 = scmp.lt.s32.totalorder %s504_s18, %s504_s18 }
 0x265   :  { %p511_p11 = por %p510_p10, %p509_p9 }
 0x267   :  { %p512_p12 = pnand %p511_p11, %p505_p8 }
 0x269   :  { %515 = shalt.err (!%p512_p12)
}
 0x26a   :  { %s516_s2 = scalar_lea.hbm %s786_s10, 128 }
 0x26b   :  { %p517_p13 = scmp.ne.s32.totalorder %s786_s10, %s516_s2  ;;  %p520_p0 = scmp.lt.u32.totalorder %s516_s2, %s786_s10 }
 0x26d   :  { %p522_p1 = pnand %p520_p0, %p517_p13 }
 0x26f   :  { %525 = shalt.err (!%p522_p1)
}
 0x270   :  { %352 = dma.vmem_to_hbm [thread:$0]  %s350_s25, 128, %s786_s10, [#allocation4]  }
 0x271   :  { %s581_s9 = smov [#allocation8]  }
 0x272   :  { %s381_s23 = sshll.u32 %s581_s9, 4  ;;  %s382_s23 = int_to_ptr.vmem [resolvable:$true] %s381_s23 }
 0x273   :  { %s526_s24 = scalar_lea.vmem %s382_s23, 128  ;;  %p531_p3 = scmp.lt.s32.totalorder %s382_s23, %s382_s23 }
 0x274   :  { %p527_p2 = scmp.ne.s32.totalorder %s382_s23, %s526_s24  ;;  %p532_p4 = scmp.lt.s32.totalorder %s526_s24, %s526_s24 }
 0x276   :  { %p533_p5 = por %p532_p4, %p531_p3 }
 0x278   :  { %p534_p6 = pnand %p533_p5, %p527_p2 }
 0x27a   :  { %537 = shalt.err (!%p534_p6)
}
 0x27b   :  { %s538_s8 = scalar_lea.hbm %s790_s14, 128 }
 0x27c   :  { %p539_p7 = scmp.ne.s32.totalorder %s790_s14, %s538_s8  ;;  %p542_p8 = scmp.lt.u32.totalorder %s538_s8, %s790_s14 }
 0x27e   :  { %p544_p9 = pnand %p542_p8, %p539_p7 }
 0x280   :  { %547 = shalt.err (!%p544_p9)
}
 0x281   :  { %384 = dma.vmem_to_hbm [thread:$0]  %s382_s23, 128, %s790_s14, [#allocation9]  }
 0x282   :  { %s582_s1 = smov [#allocation7]  }
 0x283   :  { %s371_s29 = sshll.u32 %s582_s1, 4  ;;  %s372_s29 = int_to_ptr.vmem [resolvable:$true] %s371_s29 }
 0x284   :  { %s548_s3 = scalar_lea.vmem %s372_s29, 128  ;;  %p553_p11 = scmp.lt.s32.totalorder %s372_s29, %s372_s29 }
 0x285   :  { %p549_p10 = scmp.ne.s32.totalorder %s372_s29, %s548_s3  ;;  %p554_p12 = scmp.lt.s32.totalorder %s548_s3, %s548_s3 }
 0x287   :  { %p555_p13 = por %p554_p12, %p553_p11 }
 0x289   :  { %p556_p0 = pnand %p555_p13, %p549_p10 }
 0x2e6   :  { %v332_v53 = vpop.xlane.xlu0 %331 }
 0x2e7   :  { %480 = vlog2.f32 %v332_v53 }
 0x2f1   :  { %v481_v54 = vpop.eup %480 }
 0x2f2   :  { %v334_v55 = vmul.f32 0.6931472, %v481_v54 }
 0x2f4   :  { %v335_v56 = vadd.f32 %v334_v55, %v326_v48 }
 0x2f6   :  { %v336_v57 = vsub.f32 %v720_v45, %v335_v56 }
 0x2f8   :  { %341 = vst.msk [vmem:[#allocation7] sm:$0xff] %vm323_vm6, %v336_v57 }
 0x2f9   :  { %559 = shalt.err (!%p556_p0)
}
 0x2fa   :  { %s560_s15 = scalar_lea.hbm %s789_s13, 128 }
 0x2fb   :  { %p561_p1 = scmp.ne.s32.totalorder %s789_s13, %s560_s15  ;;  %p564_p2 = scmp.lt.u32.totalorder %s560_s15, %s789_s13 }
 0x2fd   :  { %p566_p3 = pnand %p564_p2, %p561_p1 }
 0x2ff   :  { %569 = shalt.err (!%p566_p3)
}
 0x300   :  { %374 = dma.vmem_to_hbm [thread:$0]  %s372_s29, 128, %s789_s13, [#allocation6]  }
 0x301   :  { %570 = dma.done.wait [#allocation4], 128  }
 0x302   :  { %571 = vsyncadd [#allocation4], 4294967168 }
 0x303   :  { %572 = dma.done.wait [#allocation6], 256  }
 0x304   :  { %573 = vsyncadd [#allocation6], 4294967040 }
 0x305   :  { %574 = dma.done.wait [#allocation9], 128  }
 0x306   :  { %575 = vsyncadd [#allocation9], 4294967168 }
 0x307   :  { %399 = vsyncpa [#allocation4], 1 }
 0x308   :  { %400 = vsyncpa [#allocation6], 1 }
 0x309   :  { %401 = vsyncpa [#allocation9], 1 }

</bundles_post_ra>
